<compile_context>
chip_gen: v5e
topology: v5e:2x2
jax: 0.10.0
libtpu: 0.0.40
codegen_flags: <defaults>
</compile_context>

<pallas_src>
import jax
import jax.numpy as jnp
from jax import lax
from jax.experimental import pallas as pl
from jax.experimental.pallas import tpu as pltpu


def _round_up(x, m):
    return ((x + m - 1) // m) * m


def _linear_kernel(x_ref, w_ref, b_ref, o_ref, acc_ref):
    # x_ref: (tm, tk) bf16, w_ref: (N_pad, tk) bf16, b_ref: (1, N_pad) f32
    k = pl.program_id(1)

    @pl.when(k == 0)
    def _():
        acc_ref[...] = jnp.zeros_like(acc_ref)

    acc_ref[...] += lax.dot_general(
        x_ref[...], w_ref[...],
        dimension_numbers=(((1,), (1,)), ((), ())),   # contract K with K (W kept as (N, K))
        preferred_element_type=jnp.float32,
    )

    @pl.when(k == pl.num_programs(1) - 1)
    def _():
        o_ref[...] = (acc_ref[...] + b_ref[...]).astype(o_ref.dtype)


def _linear_dep_kernel(x_ref, w_ref, b_ref, d_ref, o_ref, acc_ref):
    # Same as above, fusing the optional `+ dependency` (d_ref broadcasts).
    k = pl.program_id(1)

    @pl.when(k == 0)
    def _():
        acc_ref[...] = jnp.zeros_like(acc_ref)

    acc_ref[...] += lax.dot_general(
        x_ref[...], w_ref[...],
        dimension_numbers=(((1,), (1,)), ((), ())),
        preferred_element_type=jnp.float32,
    )

    @pl.when(k == pl.num_programs(1) - 1)
    def _():
        o_ref[...] = (acc_ref[...] + b_ref[...]
                      + d_ref[...].astype(jnp.float32)).astype(o_ref.dtype)


def dependency_layer_forward(x, weight, bias, dependency=None, dependent=False,
                             *, block_m=512, compute_dtype=jnp.bfloat16):
    """Pallas implementation of DependencyLayer.forward.

    Args:
      x:          (..., input_size)
      weight:     (output_size, input_size)  -- PyTorch nn.Linear layout
      bias:       (output_size,)
      dependency: optional array broadcastable to (..., output_size)
      dependent:  mirrors self.dependent (default False)
      block_m:    target row-tile size (rounded to a multiple of 16)
      compute_dtype: MXU input dtype (bf16 halves HBM traffic; f32 accumulate)

    Returns:
      (..., output_size) float32
    """
    in_size = x.shape[-1]
    out_size = weight.shape[0]
    lead = x.shape[:-1]

    x2d = x.reshape(-1, in_size)
    m = x2d.shape[0]

    # Lane-dense output: pad N up to a multiple of 128 (full vreg lanes).
    n_pad = _round_up(out_size, 128)

    # Contraction dim: pad K to a multiple of 128 (zeros are a no-op for the
    # dot) and pick a K tile (multiple of 128, <= 512) that divides it evenly.
    k_pad = _round_up(in_size, 128)
    tk = k_pad
    if k_pad > 512:
        for cand in (512, 384, 256, 128):
            if k_pad % cand == 0:
                tk = cand
                break
    grid_k = k_pad // tk

    # Row tile: multiple of 16 (bf16 sublane packing), capped by the problem.
    tm = min(_round_up(block_m, 16), _round_up(max(m, 1), 16))
    m_pad = _round_up(m, tm)
    grid = (m_pad // tm, grid_k)

    x_p = jnp.pad(x2d.astype(compute_dtype),
                  ((0, m_pad - m), (0, k_pad - in_size)))
    w_p = jnp.pad(weight.astype(compute_dtype),
                  ((0, n_pad - out_size), (0, k_pad - in_size)))
    b_p = jnp.pad(bias.astype(jnp.float32).reshape(1, out_size),
                  ((0, 0), (0, n_pad - out_size)))

    use_dep = dependent and (dependency is not None)
    if use_dep:
        dep = jnp.asarray(dependency, jnp.float32)
        if dep.ndim <= 1:
            dep2d = jnp.broadcast_to(dep, (1, out_size))
        else:
            dep2d = dep.reshape(-1, dep.shape[-1])
            if dep2d.shape[-1] != out_size:
                dep2d = jnp.broadcast_to(dep2d, (dep2d.shape[0], out_size))
        if dep2d.shape[0] == m:
            dep_p = jnp.pad(dep2d, ((0, m_pad - m), (0, n_pad - out_size)))
            dep_spec = pl.BlockSpec((tm, n_pad), lambda i, k: (i, 0))
        elif dep2d.shape[0] == 1:
            dep_p = jnp.pad(dep2d, ((0, 0), (0, n_pad - out_size)))
            dep_spec = pl.BlockSpec((1, n_pad), lambda i, k: (0, 0))
        else:
            raise ValueError("dependency leading shape must broadcast against x")
        kernel = _linear_dep_kernel
        in_specs = [
            pl.BlockSpec((tm, tk), lambda i, k: (i, k)),
            pl.BlockSpec((n_pad, tk), lambda i, k: (0, k)),
            pl.BlockSpec((1, n_pad), lambda i, k: (0, 0)),
            dep_spec,
        ]
        args = (x_p, w_p, b_p, dep_p)
        dep_bytes = dep_p.size * 4
    else:
        kernel = _linear_kernel
        in_specs = [
            pl.BlockSpec((tm, tk), lambda i, k: (i, k)),
            pl.BlockSpec((n_pad, tk), lambda i, k: (0, k)),
            pl.BlockSpec((1, n_pad), lambda i, k: (0, 0)),
        ]
        args = (x_p, w_p, b_p)
        dep_bytes = 0

    itemsize = jnp.dtype(compute_dtype).itemsize
    cost = pl.CostEstimate(
        flops=2 * m_pad * k_pad * n_pad,
        transcendentals=0,
        bytes_accessed=(m_pad * k_pad * itemsize            # x
                        + n_pad * k_pad * itemsize          # weight
                        + n_pad * 4                         # bias
                        + dep_bytes                         # dependency
                        + m_pad * n_pad * 4),               # output
    )

    y_p = pl.pallas_call(
        kernel,
        out_shape=jax.ShapeDtypeStruct((m_pad, n_pad), jnp.float32),
        grid=grid,
        in_specs=in_specs,
        out_specs=pl.BlockSpec((tm, n_pad), lambda i, k: (i, 0)),
        scratch_shapes=[pltpu.VMEM((tm, n_pad), jnp.float32)],
        compiler_params=pltpu.CompilerParams(
            dimension_semantics=("parallel", "arbitrary")),
        cost_estimate=cost,
    )(*args)

    return y_p[:m, :out_size].reshape(lead + (out_size,))


def init_dependency_layer_params(key, input_size, output_size):
    """Deterministic init mirroring PyTorch nn.Linear default (uniform +/- 1/sqrt(fan_in))."""
    kw, kb = jax.random.split(key)
    bound = 1.0 / (input_size ** 0.5)
    weight = jax.random.uniform(
        kw, (output_size, input_size), jnp.float32, minval=-bound, maxval=bound)
    bias = jax.random.uniform(
        kb, (output_size,), jnp.float32, minval=-bound, maxval=bound)
    return weight, bias


if __name__ == "__main__":
    # Small shapes consistent with the module: x = (batch, seq, input_size)
    batch, seq, input_size, output_size = 2, 8, 32, 16
    key = jax.random.PRNGKey(0)
    kx, kp, kd = jax.random.split(key, 3)

    x = jax.random.normal(kx, (batch, seq, input_size), jnp.float32)
    weight, bias = init_dependency_layer_params(kp, input_size, output_size)

    # Forward (dependent=False by default, matching the PyTorch module __init__).
    y = dependency_layer_forward(x, weight, bias)
    y = jax.block_until_ready(y)

    # Reference in plain JAX (f32). Kernel uses bf16 inputs with f32
    # accumulation, so compare with a bf16-appropriate tolerance.
    y_ref = x @ weight.T + bias
    assert y.shape == (batch, seq, output_size)
    assert jnp.allclose(y, y_ref, atol=3e-2, rtol=3e-2), "mismatch vs reference"

    # Exercise the fused dependency path as well (dependent=True branch).
    dep = jax.random.normal(kd, (batch, seq, output_size), jnp.float32)
    y_dep = jax.block_until_ready(
        dependency_layer_forward(x, weight, bias, dependency=dep, dependent=True))
    assert jnp.allclose(y_dep, y_ref + dep, atol=3e-2, rtol=3e-2), "dep mismatch"

    print("KERNEL_OK")
</pallas_src>

<mosaic_0001>
module attributes {stable_mosaic.version = 11 : i64} {
  func.func @_linear_kernel(%arg0: i32, %arg1: i32, %arg2: memref<16x128xbf16, #tpu.memory_space<vmem>>, %arg3: memref<128x128xbf16, #tpu.memory_space<vmem>>, %arg4: memref<1x128xf32, #tpu.memory_space<vmem>>, %arg5: memref<16x128xf32, #tpu.memory_space<vmem>>, %arg6: memref<16x128xf32, #tpu.memory_space<vmem>>) attributes {dimension_semantics = [#tpu.dimension_semantics<parallel>, #tpu.dimension_semantics<arbitrary>], iteration_bounds = array<i64: 1, 1>, scalar_prefetch = 0 : i64, scratch_operands = 1 : i64, tpu.core_type = #tpu.core_type<tc>, window_params = [{transform_indices = @transform_0, window_bounds = array<i64: 16, 128>}, {transform_indices = @transform_1, window_bounds = array<i64: 128, 128>}, {pipeline_mode = #tpu.pipeline_mode<synchronous>, transform_indices = @transform_2, window_bounds = array<i64: 1, 128>}, {transform_indices = @transform_3, window_bounds = array<i64: 16, 128>}]} {
    %c0_i32 = arith.constant 0 : i32
    %0 = arith.cmpi eq, %arg1, %c0_i32 : i32
    %1 = arith.extui %0 : i1 to i32
    %c0_i32_0 = arith.constant 0 : i32
    %2 = arith.cmpi ne, %1, %c0_i32_0 : i32
    scf.if %2 {
      %cst_10 = arith.constant 0.000000e+00 : f32
      %12 = vector.broadcast %cst_10 : f32 to vector<16x128xf32>
      %c0_11 = arith.constant 0 : index
      %c0_12 = arith.constant 0 : index
      %13 = vector.load %arg6[%c0_11, %c0_12] : memref<16x128xf32, #tpu.memory_space<vmem>>, vector<16x128xf32>
      tpu.vector_store %arg6[%c0_11, %c0_12], %12 {strides = array<i32>} : memref<16x128xf32, #tpu.memory_space<vmem>>, vector<16x128xf32>,
    } else {
    }
    %c0 = arith.constant 0 : index
    %c0_1 = arith.constant 0 : index
    %3 = vector.load %arg6[%c0, %c0_1] : memref<16x128xf32, #tpu.memory_space<vmem>>, vector<16x128xf32>
    %c0_2 = arith.constant 0 : index
    %c0_3 = arith.constant 0 : index
    %4 = vector.load %arg2[%c0_2, %c0_3] : memref<16x128xbf16, #tpu.memory_space<vmem>>, vector<16x128xbf16>
    %c0_4 = arith.constant 0 : index
    %c0_5 = arith.constant 0 : index
    %5 = vector.load %arg3[%c0_4, %c0_5] : memref<128x128xbf16, #tpu.memory_space<vmem>>, vector<128x128xbf16>
    %cst = arith.constant dense<0.000000e+00> : vector<16x128xf32>
    %6 = tpu.matmul %4, %5, %cst {dimension_numbers = #tpu.dot_dimension_numbers<[1], [1], [0], [0], [0, 0, 1, 0], [], []>} : vector<16x128xbf16>, vector<128x128xbf16>, vector<16x128xf32> -> vector<16x128xf32>
    %7 = arith.addf %3, %6 : vector<16x128xf32>
    %c0_6 = arith.constant 0 : index
    %c0_7 = arith.constant 0 : index
    %8 = vector.load %arg6[%c0_6, %c0_7] : memref<16x128xf32, #tpu.memory_space<vmem>>, vector<16x128xf32>
    tpu.vector_store %arg6[%c0_6, %c0_7], %7 {strides = array<i32>} : memref<16x128xf32, #tpu.memory_space<vmem>>, vector<16x128xf32>,
    %c0_i32_8 = arith.constant 0 : i32
    %9 = arith.cmpi eq, %arg1, %c0_i32_8 : i32
    %10 = arith.extui %9 : i1 to i32
    %c0_i32_9 = arith.constant 0 : i32
    %11 = arith.cmpi ne, %10, %c0_i32_9 : i32
    scf.if %11 {
      %c0_10 = arith.constant 0 : index
      %c0_11 = arith.constant 0 : index
      %12 = vector.load %arg6[%c0_10, %c0_11] : memref<16x128xf32, #tpu.memory_space<vmem>>, vector<16x128xf32>
      %c0_12 = arith.constant 0 : index
      %c0_13 = arith.constant 0 : index
      %13 = vector.load %arg4[%c0_12, %c0_13] : memref<1x128xf32, #tpu.memory_space<vmem>>, vector<1x128xf32>
      %14 = vector.broadcast %13 : vector<1x128xf32> to vector<16x128xf32>
      %15 = arith.addf %12, %14 : vector<16x128xf32>
      %c0_14 = arith.constant 0 : index
      %c0_15 = arith.constant 0 : index
      %16 = vector.load %arg5[%c0_14, %c0_15] : memref<16x128xf32, #tpu.memory_space<vmem>>, vector<16x128xf32>
      tpu.vector_store %arg5[%c0_14, %c0_15], %15 {strides = array<i32>} : memref<16x128xf32, #tpu.memory_space<vmem>>, vector<16x128xf32>,
    } else {
    }
    return
  }
  func.func @transform_0(%arg0: i32, %arg1: i32) -> (i32, i32) {
    %c0_i32 = arith.constant 0 : i32
    return %arg0, %arg1 : i32, i32
  }
  func.func @transform_1(%arg0: i32, %arg1: i32) -> (i32, i32) {
    %c0_i32 = arith.constant 0 : i32
    %c0_i32_0 = arith.constant 0 : i32
    return %c0_i32, %arg1 : i32, i32
  }
  func.func @transform_2(%arg0: i32, %arg1: i32) -> (i32, i32) {
    %c0_i32 = arith.constant 0 : i32
    %c0_i32_0 = arith.constant 0 : i32
    %c0_i32_1 = arith.constant 0 : i32
    return %c0_i32, %c0_i32_0 : i32, i32
  }
  func.func @transform_3(%arg0: i32, %arg1: i32) -> (i32, i32) {
    %c0_i32 = arith.constant 0 : i32
    %c0_i32_0 = arith.constant 0 : i32
    return %arg0, %c0_i32 : i32, i32
  }
}

</mosaic_0001>

<bundles_post_ra>
// kernel: tpu_custom_call.1
= control target key start
LH: loop header
LB: loop body
LE: loop exit
PB: predicated region body
PF: predicated region fallthrough
CT: control target
= control target key end

     0   :  { %8 = vsyncpa [#allocation4], 0  ;;  %s348_s0 = inlined_call_operand.hbm [shape: bf16[16,128], index: 0, kind: input, shape index: {}]   ;;  %s349_s1 = inlined_call_operand.hbm [shape: bf16[128,128], index: 1, kind: input, shape index: {}]   ;;  %s350_s2 = inlined_call_operand.vmem [shape: f32[1,128], index: 2, kind: input, shape index: {}]   ;;  %s351_s3 = inlined_call_operand.hbm [shape: f32[16,128], index: 3, kind: output, shape index: {}]  }
   0x1   :  { %9 = vsyncpa [#allocation7], 0 }
   0x2   :  { %10 = vsyncpa [#allocation5], 0  ;;  %s15_s14 = sshll.u32 %s348_s0, 4  ;;  %s309_s15 = smov [#allocation3]   ;;  %s16_s14 = int_to_ptr.hbm [resolvable:$true] %s15_s14 }
   0x3   :  { %s17_s16 = sshll.u32 %s309_s15, 4  ;;  %s28_s19 = sshll.u32 %s349_s1, 4  ;;  %s18_s16 = int_to_ptr.vmem [resolvable:$true] %s17_s16  ;;  %s29_s19 = int_to_ptr.hbm [resolvable:$true] %s28_s19 }
   0x4   :  { %s310_s20 = smov 64   ;;  %s311_s21 = smov 4  }
   0x5   :  { %23 = dma.hbm_to_vmem [thread:$0]  %s16_s14, 128, %s18_s16, [#allocation4], %s310_s20, %s310_s20, %s311_s21  }
   0x6   :  { %s312_s22 = smov [#allocation6]  }
   0x7   :  { %s30_s23 = sshll.u32 %s312_s22, 4  ;;  %s31_s23 = int_to_ptr.vmem [resolvable:$true] %s30_s23 }
   0x8   :  { %36 = dma.hbm_to_vmem [thread:$0]  %s29_s19, 1024, %s31_s23, [#allocation7], %s310_s20, %s310_s20, %s311_s21  }
   0x9   :  { %303 = dma.done.wait [#allocation4], 128  }
   0xa   :  { %304 = vsyncadd [#allocation4], 4294967168 }
   0xb   :  { %305 = dma.done.wait [#allocation7], 1024  }
   0xc   :  { %306 = vsyncadd [#allocation7], 4294966272  ;;  %v222_v0 = vld [vmem:[#allocation6 + $0x38] sm:$0xff]  ;;  %v221_v1 = vld [vmem:[#allocation6 + $0x30] sm:$0xff]  ;;  %s313_s24 = smov [#allocation8]   ;;  %s164_s28 = sshll.u32 %s351_s3, 4  ;;  %s165_s28 = int_to_ptr.hbm [resolvable:$true] %s164_s28 }
   0xd   :  { %127 = vmatpush.bf16.xpose.msra.mxu0 %v222_v0  ;;  %v220_v2 = vld [vmem:[#allocation6 + $0x28] sm:$0xff]  ;;  %v219_v3 = vld [vmem:[#allocation6 + $0x20] sm:$0xff]  ;;  %v218_v4 = vld [vmem:[#allocation6 + $0x18] sm:$0xff]  ;;  %s162_s25 = sshll.u32 %s313_s24, 4  ;;  %s314_s29 = smov 128   ;;  %s163_s25 = int_to_ptr.vmem [resolvable:$true] %s162_s25 }
   0xe   :  { %v217_v5 = vld [vmem:[#allocation6 + $0x10] sm:$0xff]  ;;  %v216_v6 = vld [vmem:[#allocation6 + $0x8] sm:$0xff]  ;;  %v215_v7 = vld [vmem:[#allocation6] sm:$0xff]  ;;  %s315_s30 = smov 8  }
   0xf   :  { %v214_v8 = vld [vmem:[#allocation3] sm:$0xff] }
  0x10   :  { %v230_v9 = vld [vmem:[%s350_s2] ss:$0 sm:$0xff] }
  0x15   :  { %128 = vmatpush.bf16.xpose.msra.mxu0 %v221_v1 }
  0x1d   :  { %129 = vmatpush.bf16.xpose.msra.mxu0 %v220_v2 }
  0x25   :  { %130 = vmatpush.bf16.xpose.msra.mxu0 %v219_v3 }
  0x2d   :  { %131 = vmatpush.bf16.xpose.msra.mxu0 %v218_v4 }
  0x35   :  { %132 = vmatpush.bf16.xpose.msra.mxu0 %v217_v5 }
  0x3d   :  { %133 = vmatpush.bf16.xpose.msra.mxu0 %v216_v6 }
  0x45   :  { %134 = vmatpush.bf16.xpose.msra.mxu0 %v215_v7 }
  0x4c   :  { %135 = vmatmul.bf16.vlgmr.msra.gmra.mxu0 %v214_v8 }
  0xc9   :  { %v136_v10 = vpop.f32.mrf.mxu0 }
  0xca   :  { %v154_v11 = vadd.f32 %v230_v9, %v136_v10 }
  0xcc   :  { %156 = vst [vmem:[#allocation8] sm:$0xff] %v154_v11 }
  0xd1   :  { %v138_v12 = vpop.f32.mrf.mxu0 }
  0xd2   :  { %v155_v13 = vadd.f32 %v230_v9, %v138_v12 }
  0xd4   :  { %157 = vst [vmem:[#allocation8 + $0x8] sm:$0xff] %v155_v13 }
  0xd5   :  { %170 = dma.vmem_to_hbm [thread:$0]  %s163_s25, 256, %s165_s28, [#allocation5], %s314_s29, %s314_s29, %s315_s30  }
  0xd6   :  { %307 = dma.done.wait [#allocation5], 256  }
  0xd7   :  { %308 = vsyncadd [#allocation5], 4294967040 }
  0xd8   :  { %175 = vsyncpa [#allocation4], 1 }
  0xd9   :  { %176 = vsyncpa [#allocation7], 1 }
  0xda   :  { %177 = vsyncpa [#allocation5], 1 }

</bundles_post_ra>
